<compile_context>
chip_gen: v5e
topology: v5e:2x2
jax: 0.10.0
libtpu: 0.0.40
codegen_flags: <defaults>
</compile_context>

<pallas_src>
import jax
import jax.numpy as jnp
from jax.experimental import pallas as pl
from jax.experimental.pallas import tpu as pltpu

_SUBLANE = 8                          # f32 sublane granularity
_TM_MAX = 2048                        # preferred batch tile for the pipelined path
_ACT_BUDGET_BYTES = 8 * 1024 * 1024   # activation (x + hidden + out) VMEM budget
_VMEM_LIMIT_BYTES = 32 * 1024 * 1024  # total scoped-VMEM budget (headroom on v7x)


def _round_up(n, m):
    return ((n + m - 1) // m) * m


def _make_mlp_kernel(n_layers):
    """Fused MLP kernel. refs = (x, w1, b1, ..., wL, bL, out)."""

    def kernel(*refs):
        x_ref = refs[0]
        o_ref = refs[-1]
        wb = refs[1:-1]
        h = x_ref[...]
        for i in range(n_layers):
            w = wb[2 * i][...]        # (K_i, N_i)
            b = wb[2 * i + 1][...]    # (1, N_i), broadcasts over rows
            h = jnp.dot(h, w, preferred_element_type=jnp.float32) + b
            if i < n_layers - 1:
                h = jnp.maximum(h, 0.0)
                # nn.Dropout(p=0.5) is the identity in eval mode.
        o_ref[...] = h.astype(o_ref.dtype)

    return kernel


def init_params(architecture, key):
    """Deterministic params. Weights stored as (in, out) = PyTorch weight.T."""
    params = []
    for i in range(1, len(architecture)):
        fan_in, fan_out = architecture[i - 1], architecture[i]
        key, wk, bk = jax.random.split(key, 3)
        bound = 1.0 / jnp.sqrt(jnp.float32(fan_in))   # PyTorch Linear default range
        w = jax.random.uniform(wk, (fan_in, fan_out), jnp.float32, -bound, bound)
        b = jax.random.uniform(bk, (fan_out,), jnp.float32, -bound, bound)
        params.append((w, b))
    return params


def _check_vmem(estimate_bytes, what):
    if estimate_bytes > _VMEM_LIMIT_BYTES:
        raise ValueError(
            f"{what}: fused MLP would need ~{estimate_bytes / 2**20:.1f} MiB VMEM, "
            f"over the {_VMEM_LIMIT_BYTES / 2**20:.0f} MiB budget. Shrink the layer "
            "widths / batch tile or split the network into per-layer kernels.")


def neural_network_forward(params, x, *, tm_max=_TM_MAX, max_single_shot_rows=None):
    """Mirrors NeuralNetwork.forward (eval mode): hidden Linear+ReLU, then Linear."""
    dims = [params[0][0].shape[0]] + [w.shape[1] for w, _ in params]
    n_layers = len(params)
    M, K0 = x.shape
    assert K0 == dims[0], (K0, dims[0])

    flat_wb = []
    for w, b in params:
        flat_wb.append(w)
        flat_wb.append(b.reshape(1, -1))
    weight_bytes = sum(int(a.size) * a.dtype.itemsize for a in flat_wb)
    act_row_bytes = 4 * sum(dims)                 # x + every hidden + out, f32 / row

    kernel = _make_mlp_kernel(n_layers)
    n_in_ops = 1 + 2 * n_layers

    if max_single_shot_rows is None:
        max_single_shot_rows = max(_SUBLANE, _ACT_BUDGET_BYTES // act_row_bytes)

    if M <= max_single_shot_rows:
        # Grid-free fused call: every operand whole in VMEM, no pipeline machinery.
        _check_vmem(weight_bytes + M * act_row_bytes, "single-shot path")
        return pl.pallas_call(
            kernel,
            out_shape=jax.ShapeDtypeStruct((M, dims[-1]), x.dtype),
            in_specs=[pl.BlockSpec(memory_space=pltpu.MemorySpace.VMEM)] * n_in_ops,
            out_specs=pl.BlockSpec(memory_space=pltpu.MemorySpace.VMEM),
            compiler_params=pltpu.CompilerParams(
                vmem_limit_bytes=_VMEM_LIMIT_BYTES),
        )(x, *flat_wb)

    # Large batch: tile M over a "parallel" grid axis. x/out tiles auto-pipeline,
    # weights stay resident (constant index maps). Tile count is forced to >= 2 and
    # even so v7x's two TensorCores get balanced shards. No row padding: the ragged
    # last block is masked by Pallas on writeback (rows are independent).
    tm_cap = max(_SUBLANE,
                 (_ACT_BUDGET_BYTES // (2 * act_row_bytes)) // _SUBLANE * _SUBLANE)
    tm_target = max(_SUBLANE, min(tm_max, tm_cap))
    n_tiles = max(2, pl.cdiv(M, tm_target))
    if n_tiles % 2:
        n_tiles += 1
    tm = min(tm_target, _round_up(pl.cdiv(M, n_tiles), _SUBLANE))
    grid = (pl.cdiv(M, tm),)

    _check_vmem(2 * weight_bytes + 2 * tm * act_row_bytes, "grid path")

    in_specs = [pl.BlockSpec((tm, dims[0]), lambda i: (i, 0))]
    for li in range(n_layers):
        in_specs.append(pl.BlockSpec((dims[li], dims[li + 1]), lambda i: (0, 0)))
        in_specs.append(pl.BlockSpec((1, dims[li + 1]), lambda i: (0, 0)))

    return pl.pallas_call(
        kernel,
        out_shape=jax.ShapeDtypeStruct((M, dims[-1]), x.dtype),
        grid=grid,
        in_specs=in_specs,
        out_specs=pl.BlockSpec((tm, dims[-1]), lambda i: (i, 0)),
        compiler_params=pltpu.CompilerParams(
            dimension_semantics=("parallel",),
            vmem_limit_bytes=_VMEM_LIMIT_BYTES),
    )(x, *flat_wb)


if __name__ == "__main__":
    architecture = [32, 64, 48, 16]   # in -> hidden -> hidden -> out

    key = jax.random.PRNGKey(0)
    key, pk, xk1, xk2 = jax.random.split(key, 4)
    params = init_params(architecture, pk)

    def ref_forward(x):
        h = x
        for i, (w, b) in enumerate(params):
            h = h @ w + b
            if i < len(params) - 1:
                h = jnp.maximum(h, 0.0)
        return h

    # Small batch: single fused, grid-free kernel (the primary use case).
    x_small = jax.random.normal(xk1, (8, architecture[0]), dtype=jnp.float32)
    out_small = jax.block_until_ready(neural_network_forward(params, x_small))
    assert out_small.shape == (8, architecture[-1])
    assert jnp.allclose(out_small, ref_forward(x_small), atol=1e-5, rtol=1e-5)

    # Grid path with a ragged last tile (forced via a tiny single-shot threshold):
    # exercises >=2 even "parallel" tiles (v7x megacore) and masked-edge writeback.
    x_grid = jax.random.normal(xk2, (2085, architecture[0]), dtype=jnp.float32)
    out_grid = jax.block_until_ready(
        neural_network_forward(params, x_grid, tm_max=1024, max_single_shot_rows=0))
    assert out_grid.shape == (2085, architecture[-1])
    assert jnp.allclose(out_grid, ref_forward(x_grid), atol=1e-5, rtol=1e-5)

    print("KERNEL_OK")
</pallas_src>

<mosaic_0001>
module attributes {stable_mosaic.version = 11 : i64} {
  func.func @kernel(%arg0: memref<8x32xf32, #tpu.memory_space<vmem>>, %arg1: memref<32x64xf32, #tpu.memory_space<vmem>>, %arg2: memref<1x64xf32, #tpu.memory_space<vmem>>, %arg3: memref<64x48xf32, #tpu.memory_space<vmem>>, %arg4: memref<1x48xf32, #tpu.memory_space<vmem>>, %arg5: memref<48x16xf32, #tpu.memory_space<vmem>>, %arg6: memref<1x16xf32, #tpu.memory_space<vmem>>, %arg7: memref<8x16xf32, #tpu.memory_space<vmem>>) attributes {dimension_semantics = [], scalar_prefetch = 0 : i64, scratch_operands = 0 : i64, tpu.core_type = #tpu.core_type<tc>} {
    %c0 = arith.constant 0 : index
    %c0_0 = arith.constant 0 : index
    %0 = vector.load %arg0[%c0, %c0_0] : memref<8x32xf32, #tpu.memory_space<vmem>>, vector<8x32xf32>
    %c0_1 = arith.constant 0 : index
    %c0_2 = arith.constant 0 : index
    %1 = vector.load %arg1[%c0_1, %c0_2] : memref<32x64xf32, #tpu.memory_space<vmem>>, vector<32x64xf32>
    %c0_3 = arith.constant 0 : index
    %c0_4 = arith.constant 0 : index
    %2 = vector.load %arg2[%c0_3, %c0_4] : memref<1x64xf32, #tpu.memory_space<vmem>>, vector<1x64xf32>
    %cst = arith.constant dense<0.000000e+00> : vector<8x64xf32>
    %3 = tpu.matmul %0, %1, %cst {dimension_numbers = #tpu.dot_dimension_numbers<[1], [0], [0], [1], [0, 0, 1, 1], [], []>} : vector<8x32xf32>, vector<32x64xf32>, vector<8x64xf32> -> vector<8x64xf32>
    %4 = vector.broadcast %2 : vector<1x64xf32> to vector<8x64xf32>
    %5 = arith.addf %3, %4 : vector<8x64xf32>
    %cst_5 = arith.constant 0.000000e+00 : f32
    %6 = vector.broadcast %cst_5 : f32 to vector<8x64xf32>
    %7 = arith.maximumf %5, %6 : vector<8x64xf32>
    %c0_6 = arith.constant 0 : index
    %c0_7 = arith.constant 0 : index
    %8 = vector.load %arg3[%c0_6, %c0_7] : memref<64x48xf32, #tpu.memory_space<vmem>>, vector<64x48xf32>
    %c0_8 = arith.constant 0 : index
    %c0_9 = arith.constant 0 : index
    %9 = vector.load %arg4[%c0_8, %c0_9] : memref<1x48xf32, #tpu.memory_space<vmem>>, vector<1x48xf32>
    %cst_10 = arith.constant dense<0.000000e+00> : vector<8x48xf32>
    %10 = tpu.matmul %7, %8, %cst_10 {dimension_numbers = #tpu.dot_dimension_numbers<[1], [0], [0], [1], [0, 0, 1, 1], [], []>} : vector<8x64xf32>, vector<64x48xf32>, vector<8x48xf32> -> vector<8x48xf32>
    %11 = vector.broadcast %9 : vector<1x48xf32> to vector<8x48xf32>
    %12 = arith.addf %10, %11 : vector<8x48xf32>
    %cst_11 = arith.constant 0.000000e+00 : f32
    %13 = vector.broadcast %cst_11 : f32 to vector<8x48xf32>
    %14 = arith.maximumf %12, %13 : vector<8x48xf32>
    %c0_12 = arith.constant 0 : index
    %c0_13 = arith.constant 0 : index
    %15 = vector.load %arg5[%c0_12, %c0_13] : memref<48x16xf32, #tpu.memory_space<vmem>>, vector<48x16xf32>
    %c0_14 = arith.constant 0 : index
    %c0_15 = arith.constant 0 : index
    %16 = vector.load %arg6[%c0_14, %c0_15] : memref<1x16xf32, #tpu.memory_space<vmem>>, vector<1x16xf32>
    %cst_16 = arith.constant dense<0.000000e+00> : vector<8x16xf32>
    %17 = tpu.matmul %14, %15, %cst_16 {dimension_numbers = #tpu.dot_dimension_numbers<[1], [0], [0], [1], [0, 0, 1, 1], [], []>} : vector<8x48xf32>, vector<48x16xf32>, vector<8x16xf32> -> vector<8x16xf32>
    %18 = vector.broadcast %16 : vector<1x16xf32> to vector<8x16xf32>
    %19 = arith.addf %17, %18 : vector<8x16xf32>
    %c0_17 = arith.constant 0 : index
    %c0_18 = arith.constant 0 : index
    %20 = vector.load %arg7[%c0_17, %c0_18] : memref<8x16xf32, #tpu.memory_space<vmem>>, vector<8x16xf32>
    tpu.vector_store %arg7[%c0_17, %c0_18], %19 {strides = array<i32>} : memref<8x16xf32, #tpu.memory_space<vmem>>, vector<8x16xf32>,
    return
  }
}

</mosaic_0001>

<bundles_post_ra>
// kernel: tpu_custom_call.1
= control target key start
LH: loop header
LB: loop body
LE: loop exit
PB: predicated region body
PF: predicated region fallthrough
CT: control target
= control target key end

     0   :  { %s293_s0 = inlined_call_operand.vmem [shape: f32[8,32], index: 0, kind: input, shape index: {}]   ;;  %s294_s1 = inlined_call_operand.vmem [shape: f32[32,64], index: 1, kind: input, shape index: {}]   ;;  %s295_s2 = inlined_call_operand.vmem [shape: f32[1,64], index: 2, kind: input, shape index: {}]   ;;  %s296_s3 = inlined_call_operand.vmem [shape: f32[64,48], index: 3, kind: input, shape index: {}]   ;;  %s297_s4 = inlined_call_operand.vmem [shape: f32[1,48], index: 4, kind: input, shape index: {}]   ;;  %s298_s5 = inlined_call_operand.vmem [shape: f32[48,16], index: 5, kind: input, shape index: {}]   ;;  %s299_s6 = inlined_call_operand.vmem [shape: f32[1,16], index: 6, kind: input, shape index: {}]   ;;  %s300_s7 = inlined_call_operand.hbm [shape: f32[8,16], index: 7, kind: output, shape index: {}]  }
   0x1   :  { %v31_v0 = vld [vmem:[%s294_s1 + $0x18] sm:$0xff]  ;;  %v30_v1 = vld [vmem:[%s294_s1 + $0x10] sm:$0xff]  ;;  %v29_v3 = vld [vmem:[%s294_s1 + $0x8] sm:$0xff] }
   0x2   :  { %52 = vmatpush.msra.mxu0 %v31_v0  ;;  %v68_v2 = vld [vmem:[%s296_s3 + $0x38] sm:$0xff]  ;;  %v67_v4 = vld [vmem:[%s296_s3 + $0x30] sm:$0xff]  ;;  %v28_v5 = vld [vmem:[%s294_s1] sm:$0xff] }
   0x3   :  { %85 = vmatpush.msra.mxu1 %v68_v2  ;;  %v66_v6 = vld [vmem:[%s296_s3 + $0x28] sm:$0xff] }
   0x4   :  { %53 = vmatpush.msra.mxu0 %v30_v1 }
   0x5   :  { %86 = vmatpush.msra.mxu1 %v67_v4 }
   0x6   :  { %12 = vsyncpa [#allocation3], 0  ;;  %54 = vmatpush.msra.mxu0 %v29_v3  ;;  %v27_v7 = vld [vmem:[%s293_s0] sm:$0xff]  ;;  %vm36_vm0 = vcmask 261120   ;;  %v64_v9 = vld [vmem:[%s296_s3 + $0x18] sm:$0xff]  ;;  %vm73_vm1 = vcmask 523264  }
   0x7   :  { %v65_v8 = vld [vmem:[%s296_s3 + $0x20] sm:$0xff]  ;;  %87 = vmatpush.msra.mxu1 %v66_v6  ;;  %v63_v10 = vld [vmem:[%s296_s3 + $0x10] sm:$0xff]  ;;  %v62_v11 = vld [vmem:[%s296_s3 + $0x8] sm:$0xff]  ;;  %vm108_vm2 = vcmask 392192   ;;  %s183_s18 = smov [#allocation2]   ;;  %vm132_vm3 = vcmask 130048  }
   0x8   :  { %55 = vmatpush.msra.mxu0 %v28_v5  ;;  %v61_v12 = vld [vmem:[%s296_s3] sm:$0xff]  ;;  %v103_v13 = vld [vmem:[%s298_s5 + $0x28] sm:$0xff]  ;;  %v101_v15 = vld [vmem:[%s298_s5 + $0x18] sm:$0xff]  ;;  %s139_s19 = sshll.u32 %s183_s18, 4  ;;  %s140_s19 = int_to_ptr.vmem [resolvable:$true] %s139_s19 }
   0x9   :  { %150 = vmatmul.msk.f32.vlgmr.msra.gmra.mxu0 %vm36_vm0, %v27_v7  ;;  %88 = vmatpush.msra.mxu1 %v65_v8  ;;  %v102_v14 = vld [vmem:[%s298_s5 + $0x20] sm:$0xff]  ;;  %v100_v20 = vld [vmem:[%s298_s5 + $0x10] sm:$0xff]  ;;  %v99_v21 = vld [vmem:[%s298_s5 + $0x8] sm:$0xff] }
   0xa   :  { %122 = vmatpush.msra.mxu2 %v103_v13  ;;  %v154_v16 = vld [vmem:[%s295_s2] ss:$0 sm:$0xff] }
   0xb   :  { %89 = vmatpush.msra.mxu1 %v64_v9  ;;  %v98_v22 = vld [vmem:[%s298_s5] sm:$0xff]  ;;  %s141_s5 = sshll.u32 %s300_s7, 4  ;;  %s142_s5 = int_to_ptr.hbm [resolvable:$true] %s141_s5 }
   0xc   :  { %123 = vmatpush.msra.mxu2 %v102_v14  ;;  %v155_v23 = vld [vmem:[%s297_s4] ss:$0 sm:$0xff] }
   0xd   :  { %90 = vmatpush.msra.mxu1 %v63_v10  ;;  %v156_v27 = vld [vmem:[%s299_s6] ss:$0 sm:$0xff] }
   0xe   :  { %124 = vmatpush.msra.mxu2 %v101_v15 }
   0xf   :  { %91 = vmatpush.msra.mxu1 %v62_v11 }
  0x10   :  { %125 = vmatpush.msra.mxu2 %v100_v20 }
  0x11   :  { %92 = vmatpush.msra.mxu1 %v61_v12 }
  0x12   :  { %126 = vmatpush.msra.mxu2 %v99_v21 }
  0x14   :  { %127 = vmatpush.msra.mxu2 %v98_v22 }
  0x86   :  { %v57_v17 = vpop.f32.mrf.mxu0 }
  0x87   :  { %v58_v18 = vadd.f32 %v154_v16, %v57_v17 }
  0x89   :  { %v60_v19 = vmax.f32 %v58_v18, 0.0 }
  0x8b   :  { %151 = vmatmul.msk.f32.vlgmr.msra.gmra.mxu1 %vm73_vm1, %v60_v19 }
 0x108   :  { %v94_v24 = vpop.f32.mrf.mxu1 }
 0x109   :  { %v95_v25 = vadd.f32 %v155_v23, %v94_v24 }
 0x10b   :  { %v97_v26 = vmax.f32 %v95_v25, 0.0 }
 0x10d   :  { %152 = vmatmul.msk.f32.vlgmr.msra.gmra.mxu2 %vm108_vm2, %v97_v26 }
 0x190   :  { %v129_v28 = vpop.f32.mrf.mxu2 }
 0x191   :  { %v130_v29 = vadd.f32 %v156_v27, %v129_v28 }
 0x193   :  { %133 = vst.msk [vmem:[#allocation2] sm:$0xff] %vm132_vm3, %v130_v29 }
 0x194   :  { %144 = dma.vmem_to_hbm [thread:$0]  %s140_s19, 128, %s142_s5, [#allocation3]  }
 0x195   :  { %181 = dma.done.wait [#allocation3], 128  }
 0x196   :  { %182 = vsyncadd [#allocation3], 4294967168 }
 0x197   :  { %149 = vsyncpa [#allocation3], 1 }

</bundles_post_ra>
